<compile_context>
chip_gen: v7x
topology: tpu7x:2x2x1
jax: 0.10.0
libtpu: 0.0.40
codegen_flags: <defaults>
</compile_context>

<pallas_src>
import functools

import jax
import jax.numpy as jnp
from jax.experimental import pallas as pl
from jax.experimental.pallas import tpu as pltpu


# --------------------------------------------------------------------------- #
# Kernel
# --------------------------------------------------------------------------- #
def _mlp_kernel(x_ref, w13_ref, w2_ref, o_ref, acc_ref):
    k = pl.program_id(1)
    nk = pl.num_programs(1)

    @pl.when(k == 0)
    def _():
        acc_ref[...] = jnp.zeros_like(acc_ref)

    x = x_ref[...]                       # (tm, dp)      bf16
    w13 = w13_ref[...]                   # (dp, 2*th)    bf16  [w1 tile | w3 tile]

    # Gate + up projection in one MXU matmul; canonical ((1,),(0,)) contraction.
    h = jnp.dot(x, w13, preferred_element_type=jnp.float32)       # (tm, 2*th) f32
    th = w13.shape[1] // 2               # static, 128-lane aligned split
    h1 = h[:, :th]
    h3 = h[:, th:]
    g = (h1 * jax.nn.sigmoid(h1)) * h3   # SiLU gate in f32 (VPU + EUP)
    g = g.astype(x.dtype)                # bf16 operand for the MXU

    # Down projection partial for this hidden tile.
    partial = jnp.dot(g, w2_ref[...], preferred_element_type=jnp.float32)  # (tm, dp)

    @pl.when(k < nk - 1)
    def _():
        acc_ref[...] += partial

    @pl.when(k == nk - 1)
    def _():
        # Fuse the last partial into the writeback: skips one f32 acc store+load.
        o_ref[...] = (acc_ref[...] + partial).astype(o_ref.dtype)


# --------------------------------------------------------------------------- #
# Planning helpers
# --------------------------------------------------------------------------- #
def _round_up(v, m):
    return ((v + m - 1) // m) * m


def _tpu_caps():
    """(vmem_capacity_bytes, tensorcores_per_chip) — best effort, safe fallback."""
    kind = ""
    try:
        kind = jax.devices()[0].device_kind.lower()
    except Exception:
        pass
    vmem_cap = None
    try:
        vmem_cap = int(pltpu.get_tpu_info().vmem_capacity_bytes)
    except Exception:
        vmem_cap = None
    if vmem_cap is None:
        if "v7" in kind or "p7" in kind:
            vmem_cap = 64 << 20
        elif kind:
            vmem_cap = 128 << 20          # v5e / v6e / v5p / v4
        else:
            vmem_cap = 64 << 20           # unknown: be conservative
    n_cores = 2 if any(s in kind for s in ("v7", "p7", "v4", "v5p")) else 1
    return vmem_cap, n_cores


def make_plan(m, dim, hidden, out_itemsize):
    """Pick lane/sublane-aligned, generation-aware tile sizes."""
    LANE = 128
    dp = _round_up(dim, LANE)
    hp128 = _round_up(hidden, LANE)
    m16 = _round_up(m, 16)

    vmem_cap, n_cores = _tpu_caps()
    budget = int(0.80 * vmem_cap)

    # Hidden-tile candidates: big tiles amortize acc traffic + grid overhead;
    # prefer exact divisors of the 128-padded hidden dim (no padding waste).
    th_cands = [t for t in (512, 384, 256, 128) if t <= hp128] or [hp128]
    exact = [t for t in th_cands if hp128 % t == 0]
    th_order = exact + [t for t in th_cands if t not in exact]

    # M-tile candidates: big tiles raise FLOP/byte vs streamed weights.
    tm_cands = [t for t in (512, 384, 256, 128, 64, 32, 16) if t <= m16] or [m16]
    if n_cores >= 2:
        # Keep both TensorCores busy (parallel M axis) whenever M allows.
        both = [t for t in tm_cands if _round_up(m16, t) // t >= 2]
        tm_cands = both or [tm_cands[-1]]

    def vmem_need(tm, th):
        x_t = 2 * tm * dp * 2                 # x tile, bf16, double-buffered
        w13_t = 2 * (dp * 2 * th) * 2         # fused w13 tile, bf16, x2 buffers
        w2_t = 2 * (th * dp) * 2              # w2 tile, bf16, x2 buffers
        o_t = 2 * tm * dp * out_itemsize      # output tile, x2 buffers
        acc = tm * dp * 4                     # resident f32 accumulator
        return x_t + w13_t + w2_t + o_t + acc

    choice = None
    for tm in tm_cands:                       # prefer large tm first ...
        for th in th_order:                   # ... then the preferred th
            if vmem_need(tm, th) <= budget:
                choice = (tm, th)
                break
        if choice is not None:
            break
    if choice is None:
        choice = (tm_cands[-1], th_order[-1])
    tm, th = choice

    mp = _round_up(m, tm)
    hp = _round_up(hp128, th)
    n_m = mp // tm
    n_k = hp // th
    vmem_limit = int(min(max(vmem_need(tm, th) + (2 << 20), 32 << 20),
                         0.85 * vmem_cap))

    return dict(dp=dp, hp=hp, mp=mp, tm=tm, th=th, n_m=n_m, n_k=n_k,
                vmem_limit=vmem_limit)


# --------------------------------------------------------------------------- #
# One-time weight prep (run at model load, NOT per forward call)
# --------------------------------------------------------------------------- #
def prepare_weights(w1, w2, w3, plan):
    """Pad, cast to bf16, pre-transpose and block-interleave w1/w3.

    w1, w3: (hidden, dim); w2: (dim, hidden)  -- PyTorch nn.Linear layouts.
    Returns w13t: (dp, 2*hp), w2t: (hp, dp), both bf16.
    """
    dp, hp, th, n_k = plan["dp"], plan["hp"], plan["th"], plan["n_k"]
    hidden, dim = w1.shape
    w1p = jnp.pad(w1.astype(jnp.bfloat16), ((0, hp - hidden), (0, dp - dim)))
    w3p = jnp.pad(w3.astype(jnp.bfloat16), ((0, hp - hidden), (0, dp - dim)))
    w2p = jnp.pad(w2.astype(jnp.bfloat16), ((0, dp - dim), (0, hp - hidden)))
    # Pre-transpose so both in-kernel dots contract ((1,),(0,)): K lives on the
    # RHS sublane axis -> no per-tile vxpose / layout conversion in the kernel.
    w1t = w1p.T                              # (dp, hp)
    w3t = w3p.T                              # (dp, hp)
    w2t = w2p.T                              # (hp, dp)
    # Block-interleave so hidden tile k is one contiguous (dp, 2*th) slab:
    # cols [0:th] = w1 tile k, cols [th:2*th] = w3 tile k.
    w13t = jnp.concatenate(
        [w1t.reshape(dp, n_k, th), w3t.reshape(dp, n_k, th)], axis=2
    ).reshape(dp, 2 * hp)
    return w13t, w2t


# --------------------------------------------------------------------------- #
# Forward
# --------------------------------------------------------------------------- #
def mlp_forward_prepared(x, w13t, w2t, plan, dropout_p: float = 0.0):
    """SwiGLU MLP forward with pre-fused weights. x: (batch, seq, dim)."""
    assert dropout_p == 0.0, "only p=0 dropout (identity) is implemented"

    b, s, dim = x.shape
    m = b * s
    out_dtype = x.dtype
    dp, hp, mp = plan["dp"], plan["hp"], plan["mp"]
    tm, th, n_m, n_k = plan["tm"], plan["th"], plan["n_m"], plan["n_k"]

    x2d = jnp.pad(x.reshape(m, dim).astype(jnp.bfloat16),
                  ((0, mp - m), (0, dp - dim)))

    out_isize = jnp.dtype(out_dtype).itemsize
    cost = pl.CostEstimate(
        flops=6 * mp * dp * hp,
        transcendentals=mp * hp,
        bytes_accessed=(mp * dp * 2                    # activations in (bf16)
                        + n_m * (3 * hp * dp) * 2      # weights re-streamed per M tile
                        + mp * dp * out_isize),        # output written once
    )

    out2d = pl.pallas_call(
        _mlp_kernel,
        out_shape=jax.ShapeDtypeStruct((mp, dp), out_dtype),
        grid=(n_m, n_k),
        in_specs=[
            pl.BlockSpec((tm, dp), lambda i, k: (i, 0)),        # x (reused over k)
            pl.BlockSpec((dp, 2 * th), lambda i, k: (0, k)),    # fused w1/w3 tile
            pl.BlockSpec((th, dp), lambda i, k: (k, 0)),        # w2 tile
        ],
        out_specs=pl.BlockSpec((tm, dp), lambda i, k: (i, 0)),
        scratch_shapes=[pltpu.VMEM((tm, dp), jnp.float32)],
        compiler_params=pltpu.CompilerParams(
            dimension_semantics=("parallel", "arbitrary"),
            vmem_limit_bytes=plan["vmem_limit"],
        ),
        cost_estimate=cost,
    )(x2d, w13t, w2t)

    return out2d[:m, :dim].reshape(b, s, dim)


def mlp_forward(x, w1, w2, w3, dropout_p: float = 0.0):
    """Convenience wrapper (plans + preps weights per call; prefer the
    hoisted prepare_weights + mlp_forward_prepared path in real use)."""
    b, s, dim = x.shape
    hidden = w1.shape[0]
    plan = make_plan(b * s, dim, hidden, jnp.dtype(x.dtype).itemsize)
    w13t, w2t = prepare_weights(w1, w2, w3, plan)
    return mlp_forward_prepared(x, w13t, w2t, plan, dropout_p)


# --------------------------------------------------------------------------- #
# Reference + test
# --------------------------------------------------------------------------- #
def _reference(x, w1, w2, w3):
    h1 = jnp.einsum("bsd,hd->bsh", x, w1)
    h3 = jnp.einsum("bsd,hd->bsh", x, w3)
    g = h1 * jax.nn.sigmoid(h1) * h3
    return jnp.einsum("bsh,dh->bsd", g, w2)


if __name__ == "__main__":
    # Module hyperparameters (hidden_dim=None path of MLP.__init__):
    dim = 128
    multiple_of = 128
    hidden_dim = 4 * dim
    hidden_dim = int(2 * hidden_dim / 3)
    hidden_dim = multiple_of * ((hidden_dim + multiple_of - 1) // multiple_of)  # -> 384
    dropout = 0.0

    batch, seq = 2, 60   # m = 120 -> exercises the M padding path

    key = jax.random.PRNGKey(0)
    kx, k1, k2, k3 = jax.random.split(key, 4)
    x = jax.random.normal(kx, (batch, seq, dim), dtype=jnp.float32)
    # nn.Linear weight shapes: (out_features, in_features), no bias.
    w1 = jax.random.normal(k1, (hidden_dim, dim), dtype=jnp.float32) * (dim ** -0.5)
    w2 = jax.random.normal(k2, (dim, hidden_dim), dtype=jnp.float32) * (hidden_dim ** -0.5)
    w3 = jax.random.normal(k3, (hidden_dim, dim), dtype=jnp.float32) * (dim ** -0.5)

    # --- model-load time: plan + fuse/pre-transpose weights ONCE. ---
    plan = make_plan(batch * seq, dim, hidden_dim, jnp.dtype(x.dtype).itemsize)
    w13t, w2t = prepare_weights(w1, w2, w3, plan)
    w13t, w2t = jax.block_until_ready(w13t), jax.block_until_ready(w2t)

    # --- per-call forward: only activation padding + the Pallas kernel. ---
    fwd = jax.jit(functools.partial(mlp_forward_prepared, plan=plan,
                                    dropout_p=dropout))
    out = jax.block_until_ready(fwd(x, w13t, w2t))

    ref = _reference(x, w1, w2, w3)
    assert out.shape == (batch, seq, dim)
    # bf16 MXU operands with f32 accumulation -> loosened tolerance vs f32 ref.
    assert jnp.allclose(out, ref, atol=5e-2, rtol=5e-2), (
        f"mismatch vs reference: max |diff| = {jnp.max(jnp.abs(out - ref))}")

    print("KERNEL_OK")
</pallas_src>

<mosaic_0001>
module attributes {stable_mosaic.version = 11 : i64} {
  func.func @_mlp_kernel(%arg0: i32, %arg1: i32, %arg2: memref<128x128xbf16, #tpu.memory_space<vmem>>, %arg3: memref<128x768xbf16, #tpu.memory_space<vmem>>, %arg4: memref<384x128xbf16, #tpu.memory_space<vmem>>, %arg5: memref<128x128xf32, #tpu.memory_space<vmem>>, %arg6: memref<128x128xf32, #tpu.memory_space<vmem>>) attributes {dimension_semantics = [#tpu.dimension_semantics<parallel>, #tpu.dimension_semantics<arbitrary>], iteration_bounds = array<i64: 1, 1>, scalar_prefetch = 0 : i64, scratch_operands = 1 : i64, tpu.core_type = #tpu.core_type<tc>, window_params = [{transform_indices = @transform_0, window_bounds = array<i64: 128, 128>}, {transform_indices = @transform_1, window_bounds = array<i64: 128, 768>}, {transform_indices = @transform_2, window_bounds = array<i64: 384, 128>}, {transform_indices = @transform_3, window_bounds = array<i64: 128, 128>}]} {
    %c0_i32 = arith.constant 0 : i32
    %0 = arith.cmpi eq, %arg1, %c0_i32 : i32
    %1 = arith.extui %0 : i1 to i32
    %c0_i32_0 = arith.constant 0 : i32
    %2 = arith.cmpi ne, %1, %c0_i32_0 : i32
    scf.if %2 {
      %cst_12 = arith.constant 0.000000e+00 : f32
      %24 = vector.broadcast %cst_12 : f32 to vector<128x128xf32>
      %c0_13 = arith.constant 0 : index
      %c0_14 = arith.constant 0 : index
      %25 = vector.load %arg6[%c0_13, %c0_14] : memref<128x128xf32, #tpu.memory_space<vmem>>, vector<128x128xf32>
      tpu.vector_store %arg6[%c0_13, %c0_14], %24 {strides = array<i32>} : memref<128x128xf32, #tpu.memory_space<vmem>>, vector<128x128xf32>,
    } else {
    }
    %c0 = arith.constant 0 : index
    %c0_1 = arith.constant 0 : index
    %3 = vector.load %arg2[%c0, %c0_1] : memref<128x128xbf16, #tpu.memory_space<vmem>>, vector<128x128xbf16>
    %c0_2 = arith.constant 0 : index
    %c0_3 = arith.constant 0 : index
    %4 = vector.load %arg3[%c0_2, %c0_3] : memref<128x768xbf16, #tpu.memory_space<vmem>>, vector<128x768xbf16>
    %cst = arith.constant dense<0.000000e+00> : vector<128x768xf32>
    %5 = tpu.matmul %3, %4, %cst {dimension_numbers = #tpu.dot_dimension_numbers<[1], [0], [0], [1], [0, 0, 1, 1], [], []>} : vector<128x128xbf16>, vector<128x768xbf16>, vector<128x768xf32> -> vector<128x768xf32>
    %6 = vector.extract_strided_slice %5 {offsets = [0, 0], sizes = [128, 384], strides = [1, 1]} : vector<128x768xf32> to vector<128x384xf32>
    %7 = vector.extract_strided_slice %5 {offsets = [0, 384], sizes = [128, 384], strides = [1, 1]} : vector<128x768xf32> to vector<128x384xf32>
    %8 = arith.negf %6 : vector<128x384xf32>
    %9 = math.exp %8 : vector<128x384xf32>
    %cst_4 = arith.constant 1.000000e+00 : f32
    %10 = vector.broadcast %cst_4 : f32 to vector<128x384xf32>
    %11 = arith.addf %10, %9 : vector<128x384xf32>
    %12 = arith.divf %10, %11 : vector<128x384xf32>
    %13 = arith.mulf %6, %12 : vector<128x384xf32>
    %14 = arith.mulf %13, %7 : vector<128x384xf32>
    %15 = arith.truncf %14 : vector<128x384xf32> to vector<128x384xbf16>
    %c0_5 = arith.constant 0 : index
    %c0_6 = arith.constant 0 : index
    %16 = vector.load %arg4[%c0_5, %c0_6] : memref<384x128xbf16, #tpu.memory_space<vmem>>, vector<384x128xbf16>
    %cst_7 = arith.constant dense<0.000000e+00> : vector<128x128xf32>
    %17 = tpu.matmul %15, %16, %cst_7 {dimension_numbers = #tpu.dot_dimension_numbers<[1], [0], [0], [1], [0, 0, 1, 1], [], []>} : vector<128x384xbf16>, vector<384x128xbf16>, vector<128x128xf32> -> vector<128x128xf32>
    %c0_i32_8 = arith.constant 0 : i32
    %18 = arith.cmpi slt, %arg1, %c0_i32_8 : i32
    %19 = arith.extui %18 : i1 to i32
    %c0_i32_9 = arith.constant 0 : i32
    %20 = arith.cmpi ne, %19, %c0_i32_9 : i32
    scf.if %20 {
      %c0_12 = arith.constant 0 : index
      %c0_13 = arith.constant 0 : index
      %24 = vector.load %arg6[%c0_12, %c0_13] : memref<128x128xf32, #tpu.memory_space<vmem>>, vector<128x128xf32>
      %25 = arith.addf %24, %17 : vector<128x128xf32>
      %c0_14 = arith.constant 0 : index
      %c0_15 = arith.constant 0 : index
      %26 = vector.load %arg6[%c0_14, %c0_15] : memref<128x128xf32, #tpu.memory_space<vmem>>, vector<128x128xf32>
      tpu.vector_store %arg6[%c0_14, %c0_15], %25 {strides = array<i32>} : memref<128x128xf32, #tpu.memory_space<vmem>>, vector<128x128xf32>,
    } else {
    }
    %c0_i32_10 = arith.constant 0 : i32
    %21 = arith.cmpi eq, %arg1, %c0_i32_10 : i32
    %22 = arith.extui %21 : i1 to i32
    %c0_i32_11 = arith.constant 0 : i32
    %23 = arith.cmpi ne, %22, %c0_i32_11 : i32
    scf.if %23 {
      %c0_12 = arith.constant 0 : index
      %c0_13 = arith.constant 0 : index
      %24 = vector.load %arg6[%c0_12, %c0_13] : memref<128x128xf32, #tpu.memory_space<vmem>>, vector<128x128xf32>
      %25 = arith.addf %24, %17 : vector<128x128xf32>
      %c0_14 = arith.constant 0 : index
      %c0_15 = arith.constant 0 : index
      %26 = vector.load %arg5[%c0_14, %c0_15] : memref<128x128xf32, #tpu.memory_space<vmem>>, vector<128x128xf32>
      tpu.vector_store %arg5[%c0_14, %c0_15], %25 {strides = array<i32>} : memref<128x128xf32, #tpu.memory_space<vmem>>, vector<128x128xf32>,
    } else {
    }
    return
  }
  func.func @transform_0(%arg0: i32, %arg1: i32) -> (i32, i32) {
    %c0_i32 = arith.constant 0 : i32
    %c0_i32_0 = arith.constant 0 : i32
    return %arg0, %c0_i32 : i32, i32
  }
  func.func @transform_1(%arg0: i32, %arg1: i32) -> (i32, i32) {
    %c0_i32 = arith.constant 0 : i32
    %c0_i32_0 = arith.constant 0 : i32
    return %c0_i32, %arg1 : i32, i32
  }
  func.func @transform_2(%arg0: i32, %arg1: i32) -> (i32, i32) {
    %c0_i32 = arith.constant 0 : i32
    %c0_i32_0 = arith.constant 0 : i32
    return %arg1, %c0_i32 : i32, i32
  }
  func.func @transform_3(%arg0: i32, %arg1: i32) -> (i32, i32) {
    %c0_i32 = arith.constant 0 : i32
    %c0_i32_0 = arith.constant 0 : i32
    return %arg0, %c0_i32 : i32, i32
  }
}

</mosaic_0001>

<bundles_post_ra>
// kernel: mlp_forward_prepared.1
= control target key start
LH: loop header
LB: loop body
LE: loop exit
PB: predicated region body
PF: predicated region fallthrough
CT: control target
= control target key end

     0   :  { %8 = vsyncpa [#allocation4], 0  ;;  %s2222_s12 = smov [#allocation3]   ;;  %s2910_s0 = inlined_call_operand.vmem [shape: bf16[128,128], index: 0, kind: input, shape index: {}]   ;;  %s2911_s1 = inlined_call_operand.vmem [shape: bf16[128,768], index: 1, kind: input, shape index: {}]   ;;  %s2912_s2 = inlined_call_operand.hbm [shape: bf16[384,128], index: 2, kind: input, shape index: {}]   ;;  %s2913_s3 = inlined_call_operand.vmem [shape: f32[128,128], index: 3, kind: output, shape index: {}]  }
   0x1   :  { %s18_s13 = sshll.u32 %s2222_s12, 4  ;;  %s2198_s16 = scalar_lea.hbm %s2912_s2, 3072  ;;  %s19_s13 = int_to_ptr.vmem [resolvable:$true] %s18_s13 }
   0x2   :  { %p2199_p0 = scmp.ne.s32.totalorder %s2912_s2, %s2198_s16  ;;  %p2202_p1 = scmp.lt.u32.totalorder %s2198_s16, %s2912_s2 }
   0x4   :  { %p2204_p2 = pnand %p2202_p1, %p2199_p0 }
   0x6   :  { %2207 = shalt.err (!%p2204_p2)
}
   0x7   :  { %s2208_s21 = scalar_lea.vmem %s19_s13, 3072  ;;  %p2213_p4 = scmp.lt.s32.totalorder %s19_s13, %s19_s13 }
   0x8   :  { %p2209_p3 = scmp.ne.s32.totalorder %s19_s13, %s2208_s21  ;;  %p2214_p5 = scmp.lt.s32.totalorder %s2208_s21, %s2208_s21 }
   0xa   :  { %p2215_p6 = por %p2214_p5, %p2213_p4 }
   0xc   :  { %p2216_p7 = pnand %p2215_p6, %p2209_p3 }
   0xe   :  { %2219 = shalt.err (!%p2216_p7)
}
   0xf   :  { %s2223_s22 = smov 64   ;;  %s2224_s23 = smov 4  }
  0x10   :  { %24 = dma.hbm_to_vmem [thread:$0]  %s2912_s2, 3072, %s19_s13, [#allocation4], %s2223_s22, %s2223_s22, %s2224_s23  }
  0x11   :  { %2220 = dma.done.wait [#allocation4], 3072  }
  0x12   :  { %2221 = vsyncadd [#allocation4], 4294964224  ;;  %v2225_v0 = vmov 0   ;;  %v1902_v1 = vld [vmem:[%s2911_s1 + $0x4] ss:$24 sps:$4 sm:$0xff]   ;;  %v2381_v39 = vld [vmem:[%s2910_s0 + $0x8] sm:$0xff]  }
  0x13   :  { %433 = vmatprep.mubr.bf16.mxu0 %v2225_v0  ;;  %546 = vmatprep.mubr.bf16.mxu1 %v2225_v0  ;;  %v1904_v2 = vld [vmem:[%s2911_s1] ss:$24 sps:$4 sm:$0xff]   ;;  %v1905_v3 = vld [vmem:[%s2911_s1 + $0x34] ss:$24 sps:$4 sm:$0xff]   ;;  %v1907_v4 = vld [vmem:[%s2911_s1 + $0x30] ss:$24 sps:$4 sm:$0xff]  }
  0x14   :  { %401 = vmatprep.subr.bf16.mxu0 %v1902_v1  ;;  %v1908_v5 = vld [vmem:[%s2911_s1 + $0x64] ss:$24 sps:$4 sm:$0xff]   ;;  %v1910_v6 = vld [vmem:[%s2911_s1 + $0x60] ss:$24 sps:$4 sm:$0xff]   ;;  %v1911_v7 = vld [vmem:[%s2911_s1 + $0x94] ss:$24 sps:$4 sm:$0xff]  }
  0x15   :  { %402 = vmatpush1.bf16.msra.mxu0 %v1904_v2  ;;  %v1923_v8 = vld [vmem:[%s2911_s1 + $0xc] ss:$24 sps:$4 sm:$0xff]   ;;  %v1925_v9 = vld [vmem:[%s2911_s1 + $0x8] ss:$24 sps:$4 sm:$0xff]   ;;  %v1929_v12 = vld [vmem:[%s2911_s1 + $0x3c] ss:$24 sps:$4 sm:$0xff]  }
  0x16   :  { %403 = vmatprep.subr.bf16.mxu0 %v1905_v3  ;;  %v1913_v10 = vld [vmem:[%s2911_s1 + $0x90] ss:$24 sps:$4 sm:$0xff]   ;;  %v1914_v11 = vld [vmem:[%s2911_s1 + $0xc4] ss:$24 sps:$4 sm:$0xff]   ;;  %514 = vmatprep.subr.bf16.mxu1 %v1923_v8  ;;  %v1916_v14 = vld [vmem:[%s2911_s1 + $0xc0] ss:$24 sps:$4 sm:$0xff]  }
  0x17   :  { %515 = vmatpush1.bf16.msra.mxu1 %v1925_v9  ;;  %v1931_v13 = vld [vmem:[%s2911_s1 + $0x38] ss:$24 sps:$4 sm:$0xff]   ;;  %v1917_v15 = vld [vmem:[%s2911_s1 + $0xf4] ss:$24 sps:$4 sm:$0xff]   ;;  %v1938_v17 = vld [vmem:[%s2911_s1 + $0x68] ss:$24 sps:$4 sm:$0xff]  }
  0x18   :  { %516 = vmatprep.subr.bf16.mxu1 %v1929_v12  ;;  %v1936_v16 = vld [vmem:[%s2911_s1 + $0x6c] ss:$24 sps:$4 sm:$0xff]   ;;  %v1939_v18 = vld [vmem:[%s2911_s1 + $0x9c] ss:$24 sps:$4 sm:$0xff]   ;;  %v1919_v19 = vld [vmem:[%s2911_s1 + $0xf0] ss:$24 sps:$4 sm:$0xff]  }
  0x19   :  { %404 = vmatpush1.bf16.msra.mxu0 %v1907_v4  ;;  %v1920_v20 = vld [vmem:[%s2911_s1 + $0x124] ss:$24 sps:$4 sm:$0xff]   ;;  %v1941_v21 = vld [vmem:[%s2911_s1 + $0x98] ss:$24 sps:$4 sm:$0xff]   ;;  %v1926_v24 = vld [vmem:[%s2911_s1 + $0x154] ss:$24 sps:$4 sm:$0xff]  }
  0x1a   :  { %405 = vmatprep.subr.bf16.mxu0 %v1908_v5  ;;  %v1946_v22 = vld [vmem:[%s2911_s1 + $0xcc] ss:$24 sps:$4 sm:$0xff]   ;;  %v1922_v23 = vld [vmem:[%s2911_s1 + $0x120] ss:$24 sps:$4 sm:$0xff]   ;;  %v1949_v26 = vld [vmem:[%s2911_s1 + $0xfc] ss:$24 sps:$4 sm:$0xff]  }
  0x1b   :  { %517 = vmatpush1.bf16.msra.mxu1 %v1931_v13  ;;  %v1948_v25 = vld [vmem:[%s2911_s1 + $0xc8] ss:$24 sps:$4 sm:$0xff]   ;;  %v1935_v28 = vld [vmem:[%s2911_s1 + $0x14] ss:$24 sps:$4 sm:$0xff]   ;;  %v1951_v29 = vld [vmem:[%s2911_s1 + $0xf8] ss:$24 sps:$4 sm:$0xff]  }
  0x1c   :  { %518 = vmatprep.subr.bf16.mxu1 %v1936_v16  ;;  %v1928_v27 = vld [vmem:[%s2911_s1 + $0x150] ss:$24 sps:$4 sm:$0xff]   ;;  %v2350_v30 = vld [vmem:[%s2910_s0] sm:$0xff]   ;;  %v1959_v35 = vld [vmem:[%s2911_s1 + $0x15c] ss:$24 sps:$4 sm:$0xff]  }
  0x1d   :  { %406 = vmatpush1.bf16.msra.mxu0 %v1910_v6  ;;  %v1956_v31 = vld [vmem:[%s2911_s1 + $0x12c] ss:$24 sps:$4 sm:$0xff]   ;;  %v1933_v32 = vld [vmem:[%s2911_s1 + $0x10] ss:$24 sps:$4 sm:$0xff]   ;;  %v1943_v36 = vld [vmem:[%s2911_s1 + $0x40] ss:$24 sps:$4 sm:$0xff]  }
  0x1e   :  { %407 = vmatprep.subr.bf16.mxu0 %v1911_v7  ;;  %v1945_v33 = vld [vmem:[%s2911_s1 + $0x44] ss:$24 sps:$4 sm:$0xff]   ;;  %v1958_v34 = vld [vmem:[%s2911_s1 + $0x128] ss:$24 sps:$4 sm:$0xff]   ;;  %v1955_v37 = vld [vmem:[%s2911_s1 + $0x74] ss:$24 sps:$4 sm:$0xff]  }
  0x1f   :  { %519 = vmatpush1.bf16.msra.mxu1 %v1938_v17  ;;  %v1961_v38 = vld [vmem:[%s2911_s1 + $0x158] ss:$24 sps:$4 sm:$0xff]   ;;  %v1965_v41 = vld [vmem:[%s2911_s1 + $0xa4] ss:$24 sps:$4 sm:$0xff]   ;;  %v1969_v43 = vld [vmem:[%s2911_s1 + $0xd4] ss:$24 sps:$4 sm:$0xff]  }
  0x20   :  { %520 = vmatprep.subr.bf16.mxu1 %v1939_v18  ;;  %v1953_v40 = vld [vmem:[%s2911_s1 + $0x70] ss:$24 sps:$4 sm:$0xff]   ;;  %v1963_v42 = vld [vmem:[%s2911_s1 + $0xa0] ss:$24 sps:$4 sm:$0xff]   ;;  %v1973_v46 = vld [vmem:[%s2911_s1 + $0x104] ss:$24 sps:$4 sm:$0xff]  }
  0x21   :  { %408 = vmatpush1.bf16.msra.mxu0 %v1913_v10  ;;  %v1952_v44 = vld [vmem:[%s2910_s0 + $0x10] sm:$0xff]   ;;  %v1971_v47 = vld [vmem:[%s2911_s1 + $0x100] ss:$24 sps:$4 sm:$0xff]   ;;  %v1981_v51 = vld [vmem:[%s2911_s1 + $0x164] ss:$24 sps:$4 sm:$0xff]  }
  0x22   :  { %409 = vmatprep.subr.bf16.mxu0 %v1914_v11  ;;  %v1967_v45 = vld [vmem:[%s2911_s1 + $0xd0] ss:$24 sps:$4 sm:$0xff]   ;;  %v1977_v48 = vld [vmem:[%s2911_s1 + $0x134] ss:$24 sps:$4 sm:$0xff]   ;;  %v1962_v49 = vld [vmem:[%s2910_s0 + $0x18] sm:$0xff]  }
  0x23   :  { %521 = vmatpush1.bf16.msra.mxu1 %v1941_v21  ;;  %v1975_v50 = vld [vmem:[%s2911_s1 + $0x130] ss:$24 sps:$4 sm:$0xff]   ;;  %v1979_v52 = vld [vmem:[%s2911_s1 + $0x160] ss:$24 sps:$4 sm:$0xff]  }
  0x24   :  { %522 = vmatprep.subr.bf16.mxu1 %v1946_v22  ;;  %v1966_v53 = vld [vmem:[%s2910_s0 + $0x20] sm:$0xff]   ;;  %v1970_v54 = vld [vmem:[%s2910_s0 + $0x28] sm:$0xff]   ;;  %v1974_v55 = vld [vmem:[%s2910_s0 + $0x30] sm:$0xff]  }
  0x25   :  { %410 = vmatpush1.bf16.msra.mxu0 %v1916_v14  ;;  %v1978_v56 = vld [vmem:[%s2910_s0 + $0x38] sm:$0xff]   ;;  %v1982_v57 = vld [vmem:[#allocation3 + $0x40] sm:$0xff]   ;;  %v1984_v59 = vld [vmem:[#allocation3 + $0x48] sm:$0xff]  }
  0x26   :  { %411 = vmatprep.subr.bf16.mxu0 %v1917_v15  ;;  %v1983_v58 = vld [vmem:[#allocation3] sm:$0xff]   ;;  %v1985_v60 = vld [vmem:[#allocation3 + $0x8] sm:$0xff]   ;;  %v1986_v61 = vld [vmem:[#allocation3 + $0x50] sm:$0xff]  }
  0x27   :  { %523 = vmatpush1.bf16.msra.mxu1 %v1948_v25  ;;  %v1987_v62 = vld [vmem:[#allocation3 + $0x10] sm:$0xff]   ;;  %v1988_v63 = vld [vmem:[#allocation3 + $0x58] sm:$0xff]   ;;  %v2460_v2 = vld [vmem:[#allocation3 + $0x80] sm:$0xff]  }
  0x28   :  { %524 = vmatprep.subr.bf16.mxu1 %v1949_v26  ;;  %v1989_v1 = vld [vmem:[#allocation3 + $0x18] sm:$0xff]   ;;  %v1991_v3 = vld [vmem:[#allocation3 + $0x20] sm:$0xff]   ;;  %v2464_v4 = vld [vmem:[#allocation3 + $0x88] sm:$0xff]  }
  0x29   :  { %412 = vmatpush1.bf16.msra.mxu0 %v1919_v19  ;;  %v1992_v5 = vld [vmem:[#allocation3 + $0x68] sm:$0xff]   ;;  %v2468_v7 = vld [vmem:[#allocation3 + $0x90] sm:$0xff]   ;;  %v2472_v8 = vld [vmem:[#allocation3 + $0x98] sm:$0xff]  }
  0x2a   :  { %413 = vmatprep.subr.bf16.mxu0 %v1920_v20  ;;  %v1994_v6 = vld [vmem:[#allocation3 + $0x28] sm:$0xff]   ;;  %2938 = vst [vmem:[#allocation6_spill] sm:$0xff] %v2472_v8  ;;  %v1996_v9 = vld [vmem:[#allocation3 + $0x70] sm:$0xff]   ;;  %v2476_v11 = vld [vmem:[#allocation3 + $0xa0] sm:$0xff]  }
  0x2b   :  { %525 = vmatpush1.bf16.msra.mxu1 %v1951_v29  ;;  %v1998_v10 = vld [vmem:[#allocation3 + $0x30] sm:$0xff]   ;;  %2939 = vst [vmem:[#allocation7_spill] sm:$0xff] %v2476_v11  ;;  %v2000_v12 = vld [vmem:[#allocation3 + $0x78] sm:$0xff]   ;;  %v2480_v13 = vld [vmem:[#allocation3 + $0xa8] sm:$0xff]  }
  0x2c   :  { %526 = vmatprep.subr.bf16.mxu1 %v1956_v31  ;;  %2940 = vst [vmem:[#allocation8_spill] sm:$0xff] %v2480_v13  ;;  %v2002_v14 = vld [vmem:[#allocation3 + $0x38] sm:$0xff]   ;;  %v2485_v15 = vld [vmem:[#allocation3 + $0xb0] sm:$0xff]  }
  0x2d   :  { %414 = vmatpush1.bf16.msra.mxu0 %v1922_v23  ;;  %2941 = vst [vmem:[#allocation9_spill] sm:$0xff] %v2485_v15  ;;  %v2489_v16 = vld [vmem:[#allocation3 + $0xb8] sm:$0xff]  }
  0x2e   :  { %415 = vmatprep.subr.bf16.mxu0 %v1926_v24  ;;  %2942 = vst [vmem:[#allocation10_spill] sm:$0xff] %v2489_v16 }
  0x2f   :  { %527 = vmatpush1.bf16.msra.mxu1 %v1958_v34 }
  0x30   :  { %528 = vmatprep.subr.bf16.mxu1 %v1959_v35 }
  0x31   :  { %416 = vmatpush1.bf16.msra.mxu0 %v1928_v27 }
  0x32   :  { %627 = vmatprep.subr.bf16.mxu0 %v1935_v28 }
  0x33   :  { %529 = vmatpush1.bf16.msra.mxu1 %v1961_v38 }
  0x34   :  { %434 = vmatmul.mubr.bf16.vlgmr.msra.gmra.mrb[0].mxu0 %v2350_v30  ;;  %1770 = vmatprep.subr.bf16.mxu1 %v1982_v57 }
  0x35   :  { %628 = vmatpush1.bf16.msra.mxu0 %v1933_v32  ;;  %443 = vmatprep.mubr.bf16.mxu0 %v2225_v0 }
  0x36   :  { %629 = vmatprep.subr.bf16.mxu0 %v1945_v33  ;;  %547 = vmatmul.mubr.bf16.vlgmr.msra.gmra.mrb[0].mxu1 %v2350_v30 }
  0x37   :  { %556 = vmatprep.mubr.bf16.mxu1 %v2225_v0  ;;  %1771 = vmatpush3.bf16.msra.mxu1 %v1983_v58 }
  0x38   :  { %1772 = vmatprep.subr.bf16.mxu1 %v1984_v59 }
  0x39   :  { %630 = vmatpush1.bf16.msra.mxu0 %v1943_v36 }
  0x3a   :  { %631 = vmatprep.subr.bf16.mxu0 %v1955_v37 }
  0x3b   :  { %1773 = vmatpush3.bf16.msra.mxu1 %v1985_v60 }
  0x3c   :  { %444 = vmatmul.mubr.bf16.gmra.mrb[4].mxu0 %v2381_v39  ;;  %1774 = vmatprep.subr.bf16.mxu1 %v1986_v61 }
  0x3d   :  { %453 = vmatprep.mubr.bf16.mxu0 %v2225_v0  ;;  %632 = vmatpush1.bf16.msra.mxu0 %v1953_v40 }
  0x3e   :  { %633 = vmatprep.subr.bf16.mxu0 %v1965_v41  ;;  %557 = vmatmul.mubr.bf16.gmra.mrb[4].mxu1 %v2381_v39 }
  0x3f   :  { %566 = vmatprep.mubr.bf16.mxu1 %v2225_v0  ;;  %1775 = vmatpush3.bf16.msra.mxu1 %v1987_v62 }
  0x40   :  { %1776 = vmatprep.subr.bf16.mxu1 %v1988_v63 }
  0x41   :  { %634 = vmatpush1.bf16.msra.mxu0 %v1963_v42 }
  0x42   :  { %635 = vmatprep.subr.bf16.mxu0 %v1969_v43 }
  0x43   :  { %1777 = vmatpush3.bf16.msra.mxu1 %v1989_v1 }
  0x44   :  { %454 = vmatmul.mubr.bf16.gmra.mrb[8].mxu0 %v1952_v44 }
  0x45   :  { %463 = vmatprep.mubr.bf16.mxu0 %v2225_v0  ;;  %636 = vmatpush1.bf16.msra.mxu0 %v1967_v45 }
  0x46   :  { %637 = vmatprep.subr.bf16.mxu0 %v1973_v46  ;;  %567 = vmatmul.mubr.bf16.gmra.mrb[8].mxu1 %v1952_v44 }
  0x47   :  { %576 = vmatprep.mubr.bf16.mxu1 %v2225_v0 }
  0x49   :  { %638 = vmatpush1.bf16.msra.mxu0 %v1971_v47 }
  0x4a   :  { %639 = vmatprep.subr.bf16.mxu0 %v1977_v48 }
  0x4c   :  { %464 = vmatmul.mubr.bf16.gmra.mrb[12].mxu0 %v1962_v49 }
  0x4d   :  { %473 = vmatprep.mubr.bf16.mxu0 %v2225_v0  ;;  %640 = vmatpush1.bf16.msra.mxu0 %v1975_v50 }
  0x4e   :  { %641 = vmatprep.subr.bf16.mxu0 %v1981_v51  ;;  %577 = vmatmul.mubr.bf16.gmra.mrb[12].mxu1 %v1962_v49 }
  0x4f   :  { %586 = vmatprep.mubr.bf16.mxu1 %v2225_v0 }
  0x51   :  { %642 = vmatpush1.bf16.msra.mxu0 %v1979_v52 }
  0x52   :  { %1850 = vmatprep.subr.bf16.mxu0 %v2460_v2 }
  0x54   :  { %474 = vmatmul.mubr.bf16.gmra.mrb[16].mxu0 %v1966_v53 }
  0x55   :  { %483 = vmatprep.mubr.bf16.mxu0 %v2225_v0 }
  0x56   :  { %587 = vmatmul.mubr.bf16.gmra.mrb[16].mxu1 %v1966_v53 }
  0x57   :  { %596 = vmatprep.mubr.bf16.mxu1 %v2225_v0 }
  0x5c   :  { %484 = vmatmul.mubr.bf16.gmra.mrb[20].mxu0 %v1970_v54 }
  0x5d   :  { %493 = vmatprep.mubr.bf16.mxu0 %v2225_v0 }
  0x5e   :  { %597 = vmatmul.mubr.bf16.gmra.mrb[20].mxu1 %v1970_v54 }
  0x5f   :  { %606 = vmatprep.mubr.bf16.mxu1 %v2225_v0 }
  0x64   :  { %494 = vmatmul.mubr.bf16.gmra.mrb[24].mxu0 %v1974_v55 }
  0x65   :  { %503 = vmatprep.mubr.bf16.mxu0 %v2225_v0 }
  0x66   :  { %607 = vmatmul.mubr.bf16.gmra.mrb[24].mxu1 %v1974_v55 }
  0x67   :  { %616 = vmatprep.mubr.bf16.mxu1 %v2225_v0 }
  0x6c   :  { %504 = vmatmul.mubr.bf16.gmra.mrb[28].mxu0 %v1978_v56 }
  0x6d   :  { %659 = vmatprep.mubr.bf16.mxu0 %v2225_v0 }
  0x6e   :  { %617 = vmatmul.mubr.bf16.gmra.mrb[28].mxu1 %v1978_v56 }
  0x74   :  { %660 = vmatmul.mubr.bf16.vlgmr.msra.gmra.mrb[32].mxu0 %v2350_v30 }
  0x75   :  { %669 = vmatprep.mubr.bf16.mxu0 %v2225_v0  ;;  %1851 = vmatpush3.bf16.msra.mxu0 %v2460_v2 }
  0x76   :  { %1852 = vmatprep.subr.bf16.mxu0 %v2464_v4 }
  0x79   :  { %1853 = vmatpush3.bf16.msra.mxu0 %v2464_v4 }
  0x7a   :  { %1854 = vmatprep.subr.bf16.mxu0 %v2468_v7 }
  0x7c   :  { %670 = vmatmul.mubr.bf16.gmra.mrb[36].mxu0 %v2381_v39 }
  0x7d   :  { %679 = vmatprep.mubr.bf16.mxu0 %v2225_v0  ;;  %1855 = vmatpush3.bf16.msra.mxu0 %v2468_v7 }
  0x7e   :  { %1856 = vmatprep.subr.bf16.mxu0 %v2472_v8 }
  0x81   :  { %1857 = vmatpush3.bf16.msra.mxu0 %v2472_v8 }
  0x82   :  { %1858 = vmatprep.subr.bf16.mxu0 %v2476_v11 }
  0x84   :  { %680 = vmatmul.mubr.bf16.gmra.mrb[40].mxu0 %v1952_v44 }
  0x85   :  { %689 = vmatprep.mubr.bf16.mxu0 %v2225_v0  ;;  %1859 = vmatpush3.bf16.msra.mxu0 %v2476_v11 }
  0x86   :  { %1860 = vmatprep.subr.bf16.mxu0 %v2480_v13 }
  0x89   :  { %1861 = vmatpush3.bf16.msra.mxu0 %v2480_v13 }
  0x8a   :  { %1862 = vmatprep.subr.bf16.mxu0 %v2485_v15 }
  0x8c   :  { %690 = vmatmul.mubr.bf16.gmra.mrb[44].mxu0 %v1962_v49 }
  0x8d   :  { %699 = vmatprep.mubr.bf16.mxu0 %v2225_v0  ;;  %1863 = vmatpush3.bf16.msra.mxu0 %v2485_v15 }
  0x8e   :  { %1864 = vmatprep.subr.bf16.mxu0 %v2489_v16 }
  0x91   :  { %1865 = vmatpush3.bf16.msra.mxu0 %v2489_v16 }
  0x94   :  { %700 = vmatmul.mubr.bf16.gmra.mrb[48].mxu0 %v1966_v53 }
  0x95   :  { %709 = vmatprep.mubr.bf16.mxu0 %v2225_v0 }
  0x9c   :  { %710 = vmatmul.mubr.bf16.gmra.mrb[52].mxu0 %v1970_v54 }
  0x9d   :  { %719 = vmatprep.mubr.bf16.mxu0 %v2225_v0 }
  0xa4   :  { %720 = vmatmul.mubr.bf16.gmra.mrb[56].mxu0 %v1974_v55 }
  0xa5   :  { %729 = vmatprep.mubr.bf16.mxu0 %v2225_v0  ;;  %v1990_v0 = vld [vmem:[#allocation3 + $0x60] sm:$0xff]  }
  0xa6   :  { %1778 = vmatprep.subr.bf16.mxu1 %v1990_v0 }
  0xa7   :  { %1779 = vmatpush3.bf16.msra.mxu1 %v1991_v3 }
  0xa8   :  { %1780 = vmatprep.subr.bf16.mxu1 %v1992_v5 }
  0xab   :  { %1781 = vmatpush3.bf16.msra.mxu1 %v1994_v6 }
  0xac   :  { %730 = vmatmul.mubr.bf16.gmra.mrb[60].mxu0 %v1978_v56  ;;  %1782 = vmatprep.subr.bf16.mxu1 %v1996_v9 }
  0xaf   :  { %1783 = vmatpush3.bf16.msra.mxu1 %v1998_v10 }
  0xb0   :  { %1784 = vmatprep.subr.bf16.mxu1 %v2000_v12 }
  0xb3   :  { %1785 = vmatpush3.bf16.msra.mxu1 %v2002_v14 }
  0xb4   :  { %1882 = vmatprep.subr.bf16.mxu1 %v2460_v2 }
 0x107   :  { %v2493_v17 = vpop.f32.mrb[0].mxu0 }
 0x108   :  { %v1698_v18 = vmul.f32 -1.442695, %v2493_v17  ;;  %v2496_v19 = vpop.f32.mrb[1].mxu0 }
 0x109   :  { %v1699_v20 = vmul.f32 -1.442695, %v2496_v19  ;;  %v2499_v21 = vpop.f32.mrb[2].mxu0  ;;  %v2513_v30 = vpop.f32.mrb[0].mxu1 }
 0x10a   :  { %2006 = vpow2.f32 %v1698_v18  ;;  %v1701_v22 = vmul.f32 -1.442695, %v2499_v21  ;;  %v2502_v23 = vpop.f32.mrb[3].mxu0  ;;  %v2518_v33 = vpop.f32.mrb[1].mxu1  ;;  %v1700_v37 = vmul.f32 -1.442695, %v2513_v30 }
 0x10b   :  { %v1702_v24 = vmul.f32 -1.442695, %v2502_v23  ;;  %v2521_v35 = vpop.f32.mrb[2].mxu1 }
 0x10c   :  { %2008 = vpow2.f32 %v1701_v22  ;;  %v2524_v38 = vpop.f32.mrb[3].mxu1 }
 0x10d   :  { %2010 = vpow2.f32 %v1699_v20 }
 0x10e   :  { %2012 = vpow2.f32 %v1702_v24 }
 0x10f   :  { %v2505_v25 = vpop.f32.mrb[4].mxu0 }
 0x110   :  { %v1704_v26 = vmul.f32 -1.442695, %v2505_v25  ;;  %v2508_v27 = vpop.f32.mrb[5].mxu0 }
 0x111   :  { %v1705_v28 = vmul.f32 -1.442695, %v2508_v27  ;;  %v2511_v29 = vpop.f32.mrb[6].mxu0  ;;  %v2534_v48 = vpop.f32.mrb[4].mxu1 }
 0x112   :  { %2014 = vpow2.f32 %v1704_v26  ;;  %v1707_v31 = vmul.f32 -1.442695, %v2511_v29  ;;  %v2516_v32 = vpop.f32.mrb[7].mxu0  ;;  %v2539_v52 = vpop.f32.mrb[5].mxu1 }
 0x113   :  { %2016 = vpow2.f32 %v1705_v28  ;;  %v1708_v34 = vmul.f32 -1.442695, %v2516_v32  ;;  %v2541_v54 = vpop.f32.mrb[6].mxu1 }
 0x114   :  { %v2007_v36 = vpop.eup %2006  ;;  %2018 = vpow2.f32 %v1707_v31  ;;  %v2544_v57 = vpop.f32.mrb[7].mxu1 }
 0x115   :  { %v884_v39 = vadd.f32 1.0, %v2007_v36  ;;  %2020 = vpow2.f32 %v1708_v34 }
 0x116   :  { %v2009_v40 = vpop.eup %2008 }
 0x117   :  { %v2011_v41 = vpop.eup %2010  ;;  %2022 = vrcp.f32 %v884_v39  ;;  %v887_v42 = vadd.f32 1.0, %v2009_v40  ;;  %v2526_v43 = vpop.f32.mrb[8].mxu0 }
 0x118   :  { %v1710_v44 = vmul.f32 -1.442695, %v2526_v43  ;;  %v2529_v45 = vpop.f32.mrb[9].mxu0  ;;  %2024 = vpow2.f32 %v1700_v37  ;;  %v885_v49 = vadd.f32 1.0, %v2011_v41  ;;  %v2013_v53 = vpop.eup %2012 }
 0x119   :  { %2026 = vrcp.f32 %v887_v42  ;;  %v1711_v46 = vmul.f32 -1.442695, %v2529_v45  ;;  %v2532_v47 = vpop.f32.mrb[10].mxu0  ;;  %v888_v61 = vadd.f32 1.0, %v2013_v53  ;;  %v2553_v10 = vpop.f32.mrb[8].mxu1 }
 0x11a   :  { %v1713_v50 = vmul.f32 -1.442695, %v2532_v47  ;;  %v2537_v51 = vpop.f32.mrb[11].mxu0  ;;  %2028 = vpow2.f32 %v1710_v44  ;;  %v2559_v24 = vpop.f32.mrb[9].mxu1 }
 0x11b   :  { %2030 = vpow2.f32 %v1711_v46  ;;  %v1714_v56 = vmul.f32 -1.442695, %v2537_v51  ;;  %v2562_v31 = vpop.f32.mrb[10].mxu1 }
 0x11c   :  { %v2015_v55 = vpop.eup %2014  ;;  %2032 = vpow2.f32 %v1713_v50  ;;  %v1703_v50 = vmul.f32 -1.442695, %v2521_v35 }
 0x11d   :  { %v2017_v58 = vpop.eup %2016  ;;  %v890_v59 = vadd.f32 1.0, %v2015_v55  ;;  %2034 = vrcp.f32 %v885_v49 }
 0x11e   :  { %v2019_v60 = vpop.eup %2018  ;;  %v891_v0 = vadd.f32 1.0, %v2017_v58 }
 0x11f   :  { %v2021_v62 = vpop.eup %2020  ;;  %2036 = vrcp.f32 %v890_v59  ;;  %v893_v63 = vadd.f32 1.0, %v2019_v60  ;;  %v2546_v1 = vpop.f32.mrb[12].mxu0 }
 0x120   :  { %2038 = vpow2.f32 %v1714_v56  ;;  %v1716_v3 = vmul.f32 -1.442695, %v2546_v1  ;;  %v2549_v5 = vpop.f32.mrb[13].mxu0  ;;  %v894_v18 = vadd.f32 1.0, %v2021_v62 }
 0x121   :  { %2943 = vst [vmem:[#allocation11_spill] sm:$0xff] %v2549_v5  ;;  %v2023_v6 = vpop.eup %2022  ;;  %2040 = vrcp.f32 %v893_v63  ;;  %v2551_v9 = vpop.f32.mrb[14].mxu0  ;;  %v1717_v28 = vmul.f32 -1.442695, %v2549_v5 }
 0x122   :  { %v2025_v12 = vpop.eup %2024  ;;  %v1028_v14 = vmul.f32 %v2023_v6, %v2493_v17  ;;  %2042 = vrcp.f32 %v888_v61  ;;  %v1719_v20 = vmul.f32 -1.442695, %v2551_v9  ;;  %v2557_v22 = vpop.f32.mrb[15].mxu0 }
 0x123   :  { %2944 = vst [vmem:[#allocation12_spill] sm:$0xff] %v2557_v22  ;;  %v2027_v26 = vpop.eup %2026  ;;  %2044 = vpow2.f32 %v1716_v3  ;;  %v2568_v17 = vpop.f32.mrb[11].mxu1  ;;  %v886_v39 = vadd.f32 1.0, %v2025_v12  ;;  %v1720_v46 = vmul.f32 -1.442695, %v2557_v22 }
 0x124   :  { %v1031_v34 = vmul.f32 %v2027_v26, %v2499_v21  ;;  %2046 = vrcp.f32 %v891_v0  ;;  %v2566_v36 = vmul.f32 %v1028_v14, %v2518_v33  ;;  %v2029_v37 = vpop.eup %2028  ;;  %v2586_v59 = vpop.f32.mrb[12].mxu1  ;;  %v1715_v22 = vmul.f32 -1.442695, %v2562_v31 }
 0x125   :  { %2048 = vpow2.f32 %v1719_v20  ;;  %v2031_v40 = vpop.eup %2030  ;;  %v896_v41 = vadd.f32 1.0, %v2029_v37  ;;  %2946 = vst [vmem:[#allocation14_spill] sm:$0xff] %v2586_v59  ;;  %v2591_v0 = vpop.f32.mrb[13].mxu1 }
 0x126   :  { %2050 = vrcp.f32 %v894_v18  ;;  %v2571_v42 = vmul.f32 %v1031_v34, %v2524_v38  ;;  %v2033_v44 = vpop.eup %2032  ;;  %v897_v62 = vadd.f32 1.0, %v2031_v40  ;;  %v2594_v12 = vpop.f32.mrb[14].mxu1 }
 0x127   :  { %2052 = vpow2.f32 %v1717_v28  ;;  %v2574_v21 = vpop.f32.mrb[16].mxu0  ;;  %v2576_v49 = vpop.eup %2034  ;;  %v899_v33 = vadd.f32 1.0, %v2033_v44 }
 0x128   :  { %2054 = vrcp.f32 %v896_v41  ;;  %v2581_v55 = vpop.f32.mrb[17].mxu0  ;;  %v1722_v38 = vmul.f32 -1.442695, %v2574_v21 }
 0x129   :  { %2945 = vst [vmem:[#allocation13_spill] sm:$0xff] %v2581_v55  ;;  %v2037_v56 = vpop.eup %2036  ;;  %2056 = vrcp.f32 %v886_v39  ;;  %v2584_v58 = vpop.f32.mrb[18].mxu0 }
 0x12a   :  { %v2039_v60 = vpop.eup %2038  ;;  %v1034_v61 = vmul.f32 %v2037_v56, %v2505_v25  ;;  %2058 = vrcp.f32 %v899_v33  ;;  %v2589_v63 = vpop.f32.mrb[19].mxu0  ;;  %v1725_v6 = vmul.f32 -1.442695, %v2584_v58 }
 0x12b   :  { %2947 = vst [vmem:[#allocation15_spill] sm:$0xff] %v2589_v63  ;;  %v2041_v3 = vpop.eup %2040  ;;  %2060 = vpow2.f32 %v1720_v46  ;;  %v2602_v25 = vpop.f32.mrb[15].mxu1  ;;  %v900_v28 = vadd.f32 1.0, %v2039_v60  ;;  %v1723_v46 = vmul.f32 -1.442695, %v2581_v55 }
 0x12c   :  { %v2596_v14 = vpop.eup %2042  ;;  %v1037_v18 = vmul.f32 %v2041_v3, %v2511_v29  ;;  %2062 = vpow2.f32 %v1703_v50  ;;  %v2600_v20 = vmul.f32 %v1034_v61, %v2539_v52  ;;  %v1706_v29 = vmul.f32 -1.442695, %v2534_v48  ;;  %v2622_v60 = vpop.f32.mrb[16].mxu1 }
 0x12d   :  { %v2045_v26 = vpop.eup %2044  ;;  %2064 = vpow2.f32 %v1722_v38 }
 0x12e   :  { %v2604_v34 = vpop.eup %2046  ;;  %2066 = vrcp.f32 %v897_v62  ;;  %v902_v37 = vadd.f32 1.0, %v2045_v26  ;;  %v2607_v39 = vmul.f32 %v1037_v18, %v2544_v57  ;;  %v1726_v57 = vmul.f32 -1.442695, %v2589_v63 }
 0x12f   :  { %v2049_v40 = vpop.eup %2048  ;;  %2068 = vpow2.f32 %v1725_v6  ;;  %v2610_v41 = vpop.f32.mrb[20].mxu0  ;;  %v1709_v62 = vmul.f32 -1.442695, %v2541_v54 }
 0x130   :  { %v2612_v52 = vpop.eup %2050  ;;  %2070 = vrcp.f32 %v902_v37  ;;  %v905_v44 = vadd.f32 1.0, %v2049_v40  ;;  %v2617_v50 = vpop.f32.mrb[21].mxu0  ;;  %v1728_v26 = vmul.f32 -1.442695, %v2610_v41 }
 0x131   :  { %2948 = vst [vmem:[#allocation16_spill] sm:$0xff] %v2617_v50  ;;  %v2053_v56 = vpop.eup %2052  ;;  %2072 = vrcp.f32 %v900_v28  ;;  %v2620_v38 = vpop.f32.mrb[22].mxu0  ;;  %v1729_v16 = vmul.f32 -1.442695, %v2617_v50 }
 0x132   :  { %v2055_v61 = vpop.eup %2054  ;;  %2074 = vrcp.f32 %v905_v44  ;;  %v2625_v3 = vpop.f32.mrb[23].mxu0  ;;  %v903_v40 = vadd.f32 1.0, %v2053_v56 }
 0x133   :  { %2949 = vst [vmem:[#allocation17_spill] sm:$0xff] %v2625_v3  ;;  %v2627_v6 = vpop.eup %2056  ;;  %v1040_v18 = vmul.f32 %v2055_v61, %v2526_v43  ;;  %2076 = vpow2.f32 %v1706_v29  ;;  %v2631_v28 = vpop.f32.mrb[17].mxu1 }
 0x134   :  { %v2059_v37 = vpop.eup %2058  ;;  %2078 = vpow2.f32 %v1723_v46  ;;  %v2633_v33 = vpop.f32.mrb[18].mxu1 }
 0x135   :  { %v2061_v53 = vpop.eup %2060  ;;  %v1043_v44 = vmul.f32 %v2059_v37, %v2532_v47  ;;  %2080 = vpow2.f32 %v1726_v57  ;;  %v2638_v63 = vmul.f32 %v1040_v18, %v2559_v24  ;;  %v2640_v43 = vpop.f32.mrb[19].mxu1  ;;  %v1731_v18 = vmul.f32 -1.442695, %v2620_v38 }
 0x136   :  { %v2063_v29 = vpop.eup %2062  ;;  %2082 = vpow2.f32 %v1709_v62  ;;  %v906_v50 = vadd.f32 1.0, %v2061_v53 }
 0x137   :  { %2950 = vst [vmem:[#allocation18_spill] sm:$0xff] %v2638_v63  ;;  %v2065_v61 = vpop.eup %2064  ;;  %v889_v55 = vadd.f32 1.0, %v2063_v29  ;;  %2084 = vpow2.f32 %v1728_v26  ;;  %v2643_v46 = vmul.f32 %v1043_v44, %v2568_v17  ;;  %v2645_v56 = vpop.f32.mrb[24].mxu0  ;;  %v1712_v29 = vmul.f32 -1.442695, %v2553_v10 }
 0x138   :  { %2952 = vst [vmem:[#allocation20_spill] sm:$0xff] %v2645_v56  ;;  %v2647_v15 = vpop.eup %2066  ;;  %2086 = vrcp.f32 %v903_v40  ;;  %v908_v47 = vadd.f32 1.0, %v2065_v61  ;;  %v2649_v57 = vpop.f32.mrb[25].mxu0  ;;  %v1732_v63 = vmul.f32 -1.442695, %v2625_v3 }
 0x139   :  { %2951 = vst [vmem:[#allocation19_spill] sm:$0xff] %v2643_v46  ;;  %v2069_v24 = vpop.eup %2068  ;;  %2088 = vpow2.f32 %v1729_v16  ;;  %v2654_v37 = vpop.f32.mrb[26].mxu0 }
 0x13a   :  { %2953 = vst [vmem:[#allocation21_spill] sm:$0xff] %v2654_v37  ;;  %v2656_v26 = vpop.f32.mrb[20].mxu1  ;;  %v2071_v17 = vpop.eup %2070  ;;  %2090 = vrcp.f32 %v908_v47  ;;  %v911_v44 = vadd.f32 1.0, %v2069_v24 }
 0x13b   :  { %v2659_v40 = vpop.f32.mrb[27].mxu0  ;;  %v2661_v61 = vpop.eup %2072  ;;  %v1046_v16 = vmul.f32 %v2071_v17, %v2546_v1  ;;  %2092 = vrcp.f32 %v889_v55 }
 0x13c   :  { %v2664_v13 = vpop.f32.mrb[21].mxu1  ;;  %v2075_v62 = vpop.eup %2074  ;;  %2094 = vrcp.f32 %v911_v44 }
 0x13d   :  { %v2667_v46 = vpop.f32.mrb[22].mxu1  ;;  %v2077_v47 = vpop.eup %2076  ;;  %v1049_v24 = vmul.f32 %v2075_v62, %v2551_v9  ;;  %2096 = vpow2.f32 %v1731_v18  ;;  %v2672_v5 = vmul.f32 %v1046_v16, %v2591_v0 }
 0x13e   :  { %2954 = vst [vmem:[#allocation22_spill] sm:$0xff] %v2667_v46  ;;  %v2674_v1 = vpop.f32.mrb[23].mxu1  ;;  %v2079_v53 = vpop.eup %2078  ;;  %v892_v55 = vadd.f32 1.0, %v2077_v47  ;;  %2098 = vpow2.f32 %v1712_v29 }
 0x13f   :  { %2955 = vst [vmem:[#allocation23_spill] sm:$0xff] %v2672_v5  ;;  %v2081_v17 = vpop.eup %2080  ;;  %2100 = vrcp.f32 %v906_v50  ;;  %v2677_v44 = vmul.f32 %v1049_v24, %v2602_v25  ;;  %v2679_v3 = vpop.f32.mrb[28].mxu0  ;;  %v909_v62 = vadd.f32 1.0, %v2079_v53  ;;  %v1734_v24 = vmul.f32 -1.442695, %v2645_v56 }
 0x140   :  { %v2083_v11 = vpop.eup %2082  ;;  %2102 = vpow2.f32 %v1732_v63  ;;  %v2681_v9 = vpop.f32.mrb[29].mxu0  ;;  %v912_v8 = vadd.f32 1.0, %v2081_v17  ;;  %v1737_v53 = vmul.f32 -1.442695, %v2654_v37 }
 0x141   :  { %2956 = vst [vmem:[#allocation24_spill] sm:$0xff] %v2677_v44  ;;  %v2085_v18 = vpop.eup %2084  ;;  %v895_v0 = vadd.f32 1.0, %v2083_v11  ;;  %2104 = vpow2.f32 %v1715_v22  ;;  %v2685_v47 = vpop.f32.mrb[30].mxu0  ;;  %v1718_v44 = vmul.f32 -1.442695, %v2586_v59 }
 0x142   :  { %v2687_v29 = vpop.f32.mrb[24].mxu1  ;;  %v2689_v50 = vpop.eup %2086  ;;  %2106 = vrcp.f32 %v892_v55  ;;  %v914_v25 = vadd.f32 1.0, %v2085_v18  ;;  %v1029_v55 = vmul.f32 %v2576_v49, %v2496_v19 }
 0x143   :  { %v2692_v63 = vpop.f32.mrb[31].mxu0  ;;  %v2089_v46 = vpop.eup %2088  ;;  %2108 = vrcp.f32 %v895_v0  ;;  %v1032_v0 = vmul.f32 %v2596_v14, %v2502_v23 }
 0x144   :  { %v2694_v11 = vpop.f32.mrb[25].mxu1  ;;  %v2091_v22 = vpop.eup %2090  ;;  %2110 = vrcp.f32 %v914_v25  ;;  %v1030_v25 = vmul.f32 %v2627_v6, %v2513_v30 }
 0x145   :  { %2957 = vst [vmem:[#allocation25_spill] sm:$0xff] %v2694_v11  ;;  %v2697_v16 = vpop.f32.mrb[26].mxu1  ;;  %v2093_v5 = vpop.eup %2092  ;;  %v1052_v18 = vmul.f32 %v2091_v22, %v2574_v21  ;;  %2112 = vrcp.f32 %v909_v62  ;;  %v1735_v11 = vmul.f32 -1.442695, %v2649_v57  ;;  %v915_v21 = vadd.f32 1.0, %v2089_v46 }
 0x146   :  { %v2703_v56 = vpop.f32.mrb[27].mxu1  ;;  %v2095_v17 = vpop.eup %2094  ;;  %2114 = vpow2.f32 %v1734_v24 }
 0x147   :  { %2958 = vst [vmem:[#allocation26_spill] sm:$0xff] %v2703_v56  ;;  %v2097_v37 = vpop.eup %2096  ;;  %v1055_v19 = vmul.f32 %v2095_v17, %v2584_v58  ;;  %2116 = vrcp.f32 %v912_v8  ;;  %v2712_v49 = vmul.f32 %v1052_v18, %v2631_v28  ;;  %v661_v62 = vpop.f32.mrb[32].mxu0  ;;  %v1033_v56 = vmul.f32 %v2093_v5, %v2521_v35 }
 0x148   :  { %v2099_v22 = vpop.eup %2098  ;;  %v917_v59 = vadd.f32 1.0, %v2097_v37  ;;  %2118 = vpow2.f32 %v1737_v53  ;;  %v1077_v23 = vmul.f32 %v1029_v55, %v661_v62  ;;  %v663_v14 = vpop.f32.mrb[33].mxu0  ;;  %v1721_v37 = vmul.f32 -1.442695, %v2594_v12 }
 0x149   :  { %v2715_v30 = vpop.eup %2100  ;;  %v898_v6 = vadd.f32 1.0, %v2099_v22  ;;  %2120 = vpow2.f32 %v1718_v44  ;;  %v2718_v24 = vmul.f32 %v1055_v19, %v2640_v43  ;;  %v1078_v8 = vmul.f32 %v1030_v25, %v663_v14  ;;  %v665_v58 = vpop.f32.mrb[34].mxu0 }
 0x14a   :  { %v2720_v46 = vpop.f32.mrb[28].mxu1  ;;  %v2103_v28 = vpop.eup %2102  ;;  %2122 = vrcp.f32 %v917_v59  ;;  %v1080_v18 = vmul.f32 %v1032_v0, %v665_v58  ;;  %v1740_v19 = vmul.f32 -1.442695, %v2679_v3 }
 0x14b   :  { %v667_v17 = vpop.f32.mrb[35].mxu0  ;;  %v2722_v35 = vpop.f32.mrb[29].mxu1  ;;  %2124 = vrcp.f32 %v898_v6  ;;  %v1136_v44 = vpack.c.bf16 %v2718_v24, %v2712_v49  ;;  %v1035_v6 = vmul.f32 %v2604_v34, %v2508_v27  ;;  %v1038_v27 = vmul.f32 %v2612_v52, %v2516_v32 }
 0x14c   :  { %v2105_v5 = vpop.eup %2104  ;;  %v1081_v53 = vmul.f32 %v1033_v56, %v667_v17  ;;  %v2727_v43 = vpop.f32.mrb[30].mxu1  ;;  %2126 = vrcp.f32 %v915_v21  ;;  %v1125_v59 = vpack.c.bf16 %v1080_v18, %v1077_v23  ;;  %v1743_v56 = vmul.f32 -1.442695, %v2685_v47 }
 0x14d   :  { %v2107_v55 = vpop.eup %2106  ;;  %v901_v25 = vadd.f32 1.0, %v2105_v5  ;;  %v2730_v0 = vpop.f32.mrb[31].mxu1  ;;  %2128 = vpow2.f32 %v1735_v11  ;;  %v2959_v11 = vpack.c.bf16 %v2571_v42, %v2566_v36  ;;  %v918_v34 = vadd.f32 1.0, %v2103_v28 }
 0x14e   :  { %v2109_v62 = vpop.eup %2108  ;;  %v1126_v22 = vpack.c.bf16 %v1081_v53, %v1078_v8  ;;  %1372 = vmatprep.mubr.bf16.mxu1 %v1125_v59  ;;  %v1036_v21 = vmul.f32 %v2107_v55, %v2534_v48 }
 0x14f   :  { %v2111_v14 = vpop.eup %2110  ;;  %2130 = vrcp.f32 %v901_v25  ;;  %v671_v23 = vpop.f32.mrb[36].mxu0  ;;  %1373 = vmatmul.mubr.bf16.vlgmr.msra.gmra.mrb[32].mxu1 %v2959_v11 }
 0x150   :  { %v2735_v58 = vpop.eup %2112  ;;  %v1058_v17 = vmul.f32 %v2111_v14, %v2610_v41  ;;  %2132 = vpow2.f32 %v1721_v37  ;;  %1866 = vmatprep.mubr.bf16.mxu0 %v1126_v22  ;;  %v1083_v18 = vmul.f32 %v1035_v6, %v671_v23  ;;  %v673_v5 = vpop.f32.mrb[37].mxu0  ;;  %1890 = vmatpush3.bf16.msra.mxu1 %v2460_v2  ;;  %v1039_v41 = vmul.f32 %v2109_v62, %v2541_v54 }
 0x151   :  { %v2115_v8 = vpop.eup %2114  ;;  %2134 = vpow2.f32 %v1740_v19  ;;  %v1084_v36 = vmul.f32 %v1036_v21, %v673_v5  ;;  %v675_v42 = vpop.f32.mrb[38].mxu0  ;;  %1883 = vmatprep.subr.bf16.mxu1 %v2464_v4  ;;  %v1724_v2 = vmul.f32 -1.442695, %v2622_v60  ;;  %v1727_v6 = vmul.f32 -1.442695, %v2633_v33 }
 0x152   :  { %v2745_v48 = vpop.eup %2116  ;;  %v920_v37 = vadd.f32 1.0, %v2115_v8  ;;  %v2749_v53 = vmul.f32 %v1058_v17, %v2664_v13  ;;  %2136 = vpow2.f32 %v1743_v56  ;;  %v1086_v32 = vmul.f32 %v1038_v27, %v675_v42  ;;  %v677_v52 = vpop.f32.mrb[39].mxu0 }
 0x153   :  { %v2119_v55 = vpop.eup %2118  ;;  %v1087_v19 = vmul.f32 %v1039_v41, %v677_v52  ;;  %v1738_v13 = vmul.f32 -1.442695, %v2659_v40  ;;  %v1041_v17 = vmul.f32 %v2647_v15, %v2529_v45  ;;  %v1741_v23 = vmul.f32 -1.442695, %v2681_v9 }
 0x154   :  { %v2121_v28 = vpop.eup %2120  ;;  %2138 = vrcp.f32 %v920_v37  ;;  %v923_v25 = vadd.f32 1.0, %v2119_v55  ;;  %v1128_v62 = vpack.c.bf16 %v1086_v32, %v1083_v18  ;;  %1891 = vmatpush3.bf16.msra.mxu1 %v2464_v4  ;;  %v1044_v45 = vmul.f32 %v2661_v61, %v2537_v51 }
 0x155   :  { %v2123_v59 = vpop.eup %2122  ;;  %2140 = vrcp.f32 %v918_v34  ;;  %v904_v54 = vadd.f32 1.0, %v2121_v28  ;;  %v1129_v56 = vpack.c.bf16 %v1087_v19, %v1084_v36  ;;  %1884 = vmatprep.subr.bf16.mxu1 %v2468_v7  ;;  %v2960_v34 = vpack.c.bf16 %v2607_v39, %v2600_v20  ;;  %v2961_v39 = vld [vmem:[#allocation6_spill] sm:$0xff] }
 0x156   :  { %v2125_v22 = vpop.eup %2124  ;;  %v1061_v14 = vmul.f32 %v2123_v59, %v2620_v38  ;;  %2142 = vrcp.f32 %v923_v25  ;;  %1380 = vmatprep.mubr.bf16.mxu1 %v1128_v62  ;;  %v1730_v38 = vmul.f32 -1.442695, %v2656_v26  ;;  %v1744_v51 = vmul.f32 -1.442695, %v2692_v63 }
 0x157   :  { %v2758_v21 = vpop.eup %2126  ;;  %2144 = vrcp.f32 %v904_v54  ;;  %v1042_v4 = vmul.f32 %v2125_v22, %v2553_v10  ;;  %v681_v27 = vpop.f32.mrb[40].mxu0  ;;  %1381 = vmatmul.mubr.bf16.gmra.mrb[36].mxu1 %v2960_v34  ;;  %1867 = vmatmul.mubr.bf16.vlgmr.msra.gmra.mrb[64].mxu0 %v1129_v56  ;;  %v1736_v59 = vmul.f32 -1.442695, %v2687_v29  ;;  %v2964_v22 = vld [vmem:[#allocation11_spill] sm:$0xff] }
 0x158   :  { %v2763_v11 = vpop.eup %2128  ;;  %2146 = vpow2.f32 %v1724_v2  ;;  %v2768_v8 = vmul.f32 %v1061_v14, %v2674_v1  ;;  %v1089_v18 = vmul.f32 %v1041_v17, %v681_v27  ;;  %v683_v5 = vpop.f32.mrb[41].mxu0  ;;  %1892 = vmatpush3.bf16.msra.mxu1 %v2468_v7  ;;  %v1047_v14 = vmul.f32 %v2689_v50, %v2964_v22 }
 0x159   :  { %v2131_v15 = vpop.eup %2130  ;;  %2148 = vpow2.f32 %v1738_v13  ;;  %v1090_v37 = vmul.f32 %v1042_v4, %v683_v5  ;;  %v685_v20 = vpop.f32.mrb[42].mxu0  ;;  %1885 = vmatprep.subr.bf16.mxu1 %v2961_v39  ;;  %v2963_v13 = vld [vmem:[#allocation7_spill] sm:$0xff]  ;;  %v1739_v17 = vmul.f32 -1.442695, %v2697_v16  ;;  %v2966_v4 = vld [vmem:[#allocation12_spill] sm:$0xff]  ;;  %v2970_v5 = vld [vmem:[#allocation21_spill] sm:$0xff] }
 0x15a   :  { %v2133_v10 = vpop.eup %2132  ;;  %v1045_v41 = vmul.f32 %v2131_v15, %v2562_v31  ;;  %2150 = vpow2.f32 %v1727_v6  ;;  %v1139_v1 = vpack.c.bf16 %v2768_v8, %v2749_v53  ;;  %v1092_v61 = vmul.f32 %v1044_v45, %v685_v20  ;;  %v687_v55 = vpop.f32.mrb[43].mxu0  ;;  %v2962_v31 = vld [vmem:[#allocation22_spill] sm:$0xff]  ;;  %v2965_v6 = vld [vmem:[#allocation20_spill] sm:$0xff]  ;;  %v2967_v15 = vld [vmem:[#allocation19_spill] sm:$0xff] }
 0x15b   :  { %v2135_v36 = vpop.eup %2134  ;;  %v907_v42 = vadd.f32 1.0, %v2133_v10  ;;  %2152 = vpow2.f32 %v1741_v23  ;;  %v1733_v28 = vmul.f32 -1.442695, %v2962_v31  ;;  %v1742_v27 = vmul.f32 -1.442695, %v2720_v46  ;;  %v2968_v45 = vld [vmem:[#allocation18_spill] sm:$0xff] }
 0x15c   :  { %v926_v32 = vadd.f32 1.0, %v2135_v36  ;;  %2154 = vpow2.f32 %v1730_v38  ;;  %v1093_v7 = vmul.f32 %v1045_v41, %v687_v55  ;;  %v2137_v52 = vpop.eup %2136  ;;  %v1131_v25 = vpack.c.bf16 %v1092_v61, %v1089_v18  ;;  %1893 = vmatpush3.bf16.msra.mxu1 %v2961_v39  ;;  %v2971_v41 = vld [vmem:[#allocation25_spill] sm:$0xff]  ;;  %v2972_v36 = vld [vmem:[#allocation14_spill] sm:$0xff]  ;;  %v2973_v61 = vld [vmem:[#allocation8_spill] sm:$0xff] }
 0x15d   :  { %2156 = vrcp.f32 %v907_v42  ;;  %v929_v19 = vadd.f32 1.0, %v2137_v52  ;;  %1886 = vmatprep.subr.bf16.mxu1 %v2963_v13  ;;  %v1050_v38 = vmul.f32 %v2715_v30, %v2966_v4  ;;  %v2969_v18 = vpack.c.bf16 %v2967_v15, %v2968_v45  ;;  %v2976_v4 = vld [vmem:[#allocation13_spill] sm:$0xff] }
 0x15e   :  { %v2139_v2 = vpop.eup %2138  ;;  %2158 = vrcp.f32 %v926_v32  ;;  %v1132_v54 = vpack.c.bf16 %v1093_v7, %v1090_v37  ;;  %1388 = vmatprep.mubr.bf16.mxu1 %v1131_v25  ;;  %v2974_v7 = vld [vmem:[#allocation26_spill] sm:$0xff] }
 0x15f   :  { %v2785_v62 = vpop.eup %2140  ;;  %v1064_v56 = vmul.f32 %v2139_v2, %v2965_v6  ;;  %2160 = vpow2.f32 %v1744_v51  ;;  %v691_v34 = vpop.f32.mrb[44].mxu0  ;;  %1389 = vmatmul.mubr.bf16.gmra.mrb[40].mxu1 %v2969_v18 }
 0x160   :  { %v2143_v23 = vpop.eup %2142  ;;  %2162 = vrcp.f32 %v929_v19  ;;  %1870 = vmatprep.mubr.bf16.mxu0 %v1132_v54  ;;  %v1095_v20 = vmul.f32 %v1047_v14, %v691_v34  ;;  %v693_v39 = vpop.f32.mrb[45].mxu0  ;;  %1894 = vmatpush3.bf16.msra.mxu1 %v2963_v13  ;;  %v1745_v19 = vmul.f32 -1.442695, %v2727_v43 }
 0x161   :  { %v2145_v50 = vpop.eup %2144  ;;  %v1067_v10 = vmul.f32 %v2143_v23, %v2970_v5  ;;  %2164 = vpow2.f32 %v1733_v28  ;;  %v2799_v37 = vmul.f32 %v1064_v56, %v2971_v41  ;;  %v695_v51 = vpop.f32.mrb[46].mxu0  ;;  %1887 = vmatprep.subr.bf16.mxu1 %v2973_v61  ;;  %v921_v56 = vadd.f32 1.0, %v2763_v11  ;;  %v2978_v5 = vld [vmem:[#allocation23_spill] sm:$0xff] }
 0x162   :  { %v2147_v30 = vpop.eup %2146  ;;  %v1048_v42 = vmul.f32 %v2145_v50, %v2972_v36  ;;  %2166 = vpow2.f32 %v1736_v59  ;;  %v1098_v28 = vmul.f32 %v1050_v38, %v695_v51  ;;  %v697_v25 = vpop.f32.mrb[47].mxu0  ;;  %v1053_v38 = vmul.f32 %v2735_v58, %v2976_v4  ;;  %v2977_v50 = vld [vmem:[#allocation24_spill] sm:$0xff]  ;;  %v2980_v41 = vld [vmem:[#allocation15_spill] sm:$0xff]  ;;  %v2981_v51 = vld [vmem:[#allocation10_spill] sm:$0xff] }
 0x163   :  { %v2149_v55 = vpop.eup %2148  ;;  %v910_v32 = vadd.f32 1.0, %v2147_v30  ;;  %2168 = vpow2.f32 %v1739_v17  ;;  %v2805_v52 = vmul.f32 %v1067_v10, %v2974_v7  ;;  %v2975_v17 = vld [vmem:[#allocation9_spill] sm:$0xff]  ;;  %v2979_v10 = vpack.c.bf16 %v2977_v50, %v2978_v5 }
 0x164   :  { %v2151_v2 = vpop.eup %2150  ;;  %2170 = vpow2.f32 %v1742_v27  ;;  %v1096_v54 = vmul.f32 %v1048_v42, %v693_v39  ;;  %v1134_v14 = vpack.c.bf16 %v1098_v28, %v1095_v20  ;;  %1895 = vmatpush3.bf16.msra.mxu1 %v2973_v61  ;;  %v924_v15 = vadd.f32 1.0, %v2149_v55 }
 0x165   :  { %v2153_v13 = vpop.eup %2152  ;;  %2172 = vrcp.f32 %v910_v32  ;;  %v913_v22 = vadd.f32 1.0, %v2151_v2  ;;  %v1142_v59 = vpack.c.bf16 %v2805_v52, %v2799_v37  ;;  %1888 = vmatprep.subr.bf16.mxu1 %v2975_v17  ;;  %v1056_v20 = vmul.f32 %v2745_v48, %v2980_v41 }
 0x166   :  { %v2155_v6 = vpop.eup %2154  ;;  %1396 = vmatprep.mubr.bf16.mxu1 %v1134_v14 }
 0x167   :  { %v2157_v23 = vpop.eup %2156  ;;  %2174 = vrcp.f32 %v913_v22  ;;  %v916_v27 = vadd.f32 1.0, %v2155_v6  ;;  %v701_v18 = vpop.f32.mrb[48].mxu0  ;;  %1397 = vmatmul.mubr.bf16.gmra.mrb[44].mxu1 %v2979_v10 }
 0x168   :  { %v2159_v34 = vpop.eup %2158  ;;  %v1051_v45 = vmul.f32 %v2157_v23, %v2594_v12  ;;  %2176 = vpow2.f32 %v1745_v19  ;;  %v1101_v58 = vmul.f32 %v1053_v38, %v701_v18  ;;  %v703_v30 = vpop.f32.mrb[49].mxu0  ;;  %1896 = vmatpush3.bf16.msra.mxu1 %v2975_v17  ;;  %v2982_v17 = vld [vmem:[#allocation16_spill] sm:$0xff] }
 0x169   :  { %v2161_v11 = vpop.eup %2160  ;;  %v1070_v39 = vmul.f32 %v2159_v34, %v2679_v3  ;;  %2178 = vrcp.f32 %v916_v27  ;;  %v705_v42 = vpop.f32.mrb[50].mxu0  ;;  %1889 = vmatprep.subr.bf16.mxu1 %v2981_v51  ;;  %v1059_v23 = vmul.f32 %v2758_v21, %v2982_v17  ;;  %v2983_v34 = vld [vmem:[#allocation17_spill] sm:$0xff] }
 0x16a   :  { %v2163_v36 = vpop.eup %2162  ;;  %2180 = vrcp.f32 %v921_v56  ;;  %v1099_v12 = vmul.f32 %v1051_v45, %v697_v25  ;;  %v1104_v48 = vmul.f32 %v1056_v20, %v705_v42  ;;  %v707_v7 = vpop.f32.mrb[51].mxu0  ;;  %v927_v56 = vadd.f32 1.0, %v2153_v13 }
 0x16b   :  { %v2165_v61 = vpop.eup %2164  ;;  %v1073_v55 = vmul.f32 %v2163_v36, %v2685_v47  ;;  %v2826_v32 = vmul.f32 %v1070_v39, %v2722_v35  ;;  %2182 = vrcp.f32 %v924_v15  ;;  %v930_v38 = vadd.f32 1.0, %v2161_v11 }
 0x16c   :  { %v2167_v3 = vpop.eup %2166  ;;  %v919_v28 = vadd.f32 1.0, %v2165_v61  ;;  %v1135_v2 = vpack.c.bf16 %v1099_v12, %v1096_v54  ;;  %v1137_v25 = vpack.c.bf16 %v1104_v48, %v1101_v58  ;;  %1897 = vmatpush3.bf16.msra.mxu1 %v2981_v51  ;;  %v1062_v15 = vmul.f32 %v2785_v62, %v2983_v34 }
 0x16d   :  { %v2169_v19 = vpop.eup %2168  ;;  %v922_v22 = vadd.f32 1.0, %v2167_v3  ;;  %v2829_v14 = vmul.f32 %v1073_v55, %v2730_v0 }
 0x16e   :  { %v2171_v6 = vpop.eup %2170  ;;  %2184 = vrcp.f32 %v919_v28  ;;  %v925_v47 = vadd.f32 1.0, %v2169_v19  ;;  %1871 = vmatmul.mubr.bf16.gmra.mrb[68].mxu0 %v1135_v2  ;;  %1404 = vmatprep.mubr.bf16.mxu1 %v1137_v25 }
 0x16f   :  { %v2173_v35 = vpop.eup %2172  ;;  %2186 = vrcp.f32 %v922_v22  ;;  %v928_v4 = vadd.f32 1.0, %v2171_v6  ;;  %v1145_v54 = vpack.c.bf16 %v2829_v14, %v2826_v32  ;;  %v711_v27 = vpop.f32.mrb[52].mxu0  ;;  %1405 = vmatmul.mubr.bf16.gmra.mrb[48].mxu1 %v1136_v44 }
 0x170   :  { %v1054_v0 = vmul.f32 %v2173_v35, %v2622_v60  ;;  %2188 = vrcp.f32 %v925_v47  ;;  %v1107_v21 = vmul.f32 %v1059_v23, %v711_v27  ;;  %v713_v45 = vpop.f32.mrb[53].mxu0 }
 0x171   :  { %v2175_v13 = vpop.eup %2174  ;;  %2190 = vrcp.f32 %v927_v56  ;;  %v715_v10 = vpop.f32.mrb[54].mxu0 }
 0x172   :  { %v2177_v18 = vpop.eup %2176  ;;  %v1057_v50 = vmul.f32 %v2175_v13, %v2633_v33  ;;  %v1102_v5 = vmul.f32 %v1054_v0, %v703_v30  ;;  %2192 = vrcp.f32 %v928_v4  ;;  %v1110_v41 = vmul.f32 %v1062_v15, %v715_v10  ;;  %v717_v20 = vpop.f32.mrb[55].mxu0 }
 0x173   :  { %v2179_v60 = vpop.eup %2178  ;;  %v931_v11 = vadd.f32 1.0, %v2177_v18  ;;  %2194 = vrcp.f32 %v930_v38 }
 0x174   :  { %v2181_v39 = vpop.eup %2180  ;;  %v1060_v49 = vmul.f32 %v2179_v60, %v2656_v26  ;;  %v1105_v24 = vmul.f32 %v1057_v50, %v707_v7  ;;  %v1140_v44 = vpack.c.bf16 %v1110_v41, %v1107_v21 }
 0x175   :  { %2196 = vrcp.f32 %v931_v11  ;;  %v2183_v62 = vpop.eup %2182  ;;  %v1065_v12 = vmul.f32 %v2181_v39, %v2649_v57 }
 0x176   :  { %v1138_v58 = vpack.c.bf16 %v1105_v24, %v1102_v5  ;;  %v1108_v36 = vmul.f32 %v1060_v49, %v713_v45  ;;  %1412 = vmatprep.mubr.bf16.mxu1 %v1140_v44  ;;  %v1068_v51 = vmul.f32 %v2183_v62, %v2659_v40 }
 0x177   :  { %v721_v30 = vpop.f32.mrb[56].mxu0  ;;  %1413 = vmatmul.mubr.bf16.gmra.mrb[52].mxu1 %v1139_v1 }
 0x178   :  { %v2185_v33 = vpop.eup %2184  ;;  %v1113_v61 = vmul.f32 %v1065_v12, %v721_v30  ;;  %v723_v55 = vpop.f32.mrb[57].mxu0 }
 0x179   :  { %v2187_v42 = vpop.eup %2186  ;;  %v1063_v26 = vmul.f32 %v2185_v33, %v2962_v31  ;;  %v725_v3 = vpop.f32.mrb[58].mxu0 }
 0x17a   :  { %v2189_v48 = vpop.eup %2188  ;;  %v1066_v7 = vmul.f32 %v2187_v42, %v2687_v29  ;;  %v1116_v2 = vmul.f32 %v1068_v51, %v725_v3  ;;  %v727_v19 = vpop.f32.mrb[59].mxu0 }
 0x17b   :  { %v1069_v57 = vmul.f32 %v2189_v48, %v2697_v16  ;;  %v1111_v28 = vmul.f32 %v1063_v26, %v717_v20  ;;  %v2191_v22 = vpop.eup %2190 }
 0x17c   :  { %v1114_v25 = vmul.f32 %v1066_v7, %v723_v55  ;;  %v2193_v53 = vpop.eup %2192  ;;  %v1143_v1 = vpack.c.bf16 %v1116_v2, %v1113_v61  ;;  %v1071_v31 = vmul.f32 %v2191_v22, %v2681_v9 }
 0x17d   :  { %v1141_v8 = vpack.c.bf16 %v1111_v28, %v1108_v36  ;;  %v1117_v6 = vmul.f32 %v1069_v57, %v727_v19  ;;  %v2195_v40 = vpop.eup %2194  ;;  %v1072_v29 = vmul.f32 %v2193_v53, %v2720_v46 }
 0x17e   :  { %1420 = vmatprep.mubr.bf16.mxu1 %v1143_v1  ;;  %v1074_v16 = vmul.f32 %v2195_v40, %v2692_v63 }
 0x17f   :  { %v2197_v56 = vpop.eup %2196  ;;  %v1144_v47 = vpack.c.bf16 %v1117_v6, %v1114_v25  ;;  %v731_v35 = vpop.f32.mrb[60].mxu0  ;;  %1421 = vmatmul.mubr.bf16.gmra.mrb[56].mxu1 %v1142_v59 }
 0x180   :  { %v1119_v17 = vmul.f32 %v1071_v31, %v731_v35  ;;  %v733_v23 = vpop.f32.mrb[61].mxu0  ;;  %v1075_v4 = vmul.f32 %v2197_v56, %v2727_v43 }
 0x181   :  { %v1120_v0 = vmul.f32 %v1072_v29, %v733_v23  ;;  %v735_v38 = vpop.f32.mrb[62].mxu0 }
 0x182   :  { %v1122_v27 = vmul.f32 %v1074_v16, %v735_v38  ;;  %v737_v13 = vpop.f32.mrb[63].mxu0 }
 0x183   :  { %v1123_v9 = vmul.f32 %v1075_v4, %v737_v13 }
 0x184   :  { %v1146_v34 = vpack.c.bf16 %v1122_v27, %v1119_v17 }
 0x185   :  { %v1147_v15 = vpack.c.bf16 %v1123_v9, %v1120_v0 }
 0x186   :  { %1428 = vmatprep.mubr.bf16.mxu1 %v1146_v34 }
 0x187   :  { %1429 = vmatmul.mubr.bf16.gmra.mrb[60].mxu1 %v1145_v54 }
 0x188   :  { %1874 = vmatprep.mubr.bf16.mxu1 %v1138_v58 }
 0x18f   :  { %1875 = vmatmul.mubr.bf16.vlgmr.msra.gmra.mrb[64].mxu1 %v1141_v8 }
 0x190   :  { %1878 = vmatprep.mubr.bf16.mxu1 %v1144_v47 }
 0x197   :  { %1879 = vmatmul.mubr.bf16.gmra.mrb[68].mxu1 %v1147_v15 }
 0x222   :  { %v1786_v63 = vpop.f32.mrb[32].mxu1 }
 0x223   :  { %v1787_v46 = vpop.f32.mrb[33].mxu1 }
 0x224   :  { %v1788_v37 = vadd.f32 %v1787_v46, %v1786_v63  ;;  %v1789_v43 = vpop.f32.mrb[34].mxu1 }
 0x225   :  { %v1790_v52 = vpop.f32.mrb[35].mxu1 }
 0x226   :  { %v1791_v59 = vadd.f32 %v1790_v52, %v1789_v43 }
 0x22a   :  { %v1792_v21 = vpop.f32.mrb[36].mxu1  ;;  %v1868_v45 = vpop.f32.mrb[64].mxu0 }
 0x22b   :  { %v1793_v18 = vpop.f32.mrb[37].mxu1  ;;  %v1471_v50 = vpop.f32.mrb[65].mxu0 }
 0x22c   :  { %v1794_v5 = vadd.f32 %v1793_v18, %v1792_v21  ;;  %v1472_v10 = vadd.f32 %v1788_v37, %v1471_v50  ;;  %v1795_v60 = vpop.f32.mrb[38].mxu1  ;;  %v1869_v11 = vpop.f32.mrb[66].mxu0 }
 0x22d   :  { %v1796_v32 = vpop.f32.mrb[39].mxu1  ;;  %v1474_v14 = vpop.f32.mrb[67].mxu0 }
 0x22e   :  { %v1480_v54 = vadd.f32 %v1868_v45, %v1794_v5  ;;  %1621 = vst [vmem:[%s2913_s3] sm:$0xff] %v1472_v10  ;;  %v1797_v41 = vadd.f32 %v1796_v32, %v1795_v60  ;;  %v1475_v20 = vadd.f32 %v1791_v59, %v1474_v14 }
 0x230   :  { %1623 = vst [vmem:[%s2913_s3 + $0x10] sm:$0xff] %v1480_v54  ;;  %v1483_v39 = vadd.f32 %v1869_v11, %v1797_v41  ;;  %1622 = vst [vmem:[%s2913_s3 + $0x8] sm:$0xff] %v1475_v20 }
 0x232   :  { %1624 = vst [vmem:[%s2913_s3 + $0x18] sm:$0xff] %v1483_v39  ;;  %v1798_v49 = vpop.f32.mrb[40].mxu1 }
 0x233   :  { %v1799_v24 = vpop.f32.mrb[41].mxu1 }
 0x234   :  { %v1800_v44 = vadd.f32 %v1799_v24, %v1798_v49  ;;  %v1801_v62 = vpop.f32.mrb[42].mxu1 }
 0x235   :  { %v1802_v58 = vpop.f32.mrb[43].mxu1 }
 0x236   :  { %v1803_v36 = vadd.f32 %v1802_v58, %v1801_v62 }
 0x23a   :  { %v1804_v12 = vpop.f32.mrb[44].mxu1 }
 0x23b   :  { %v1805_v33 = vpop.f32.mrb[45].mxu1 }
 0x23c   :  { %v1806_v30 = vadd.f32 %v1805_v33, %v1804_v12  ;;  %v1807_v42 = vpop.f32.mrb[46].mxu1 }
 0x23d   :  { %v1808_v51 = vpop.f32.mrb[47].mxu1 }
 0x23e   :  { %v1809_v26 = vadd.f32 %v1808_v51, %v1807_v42 }
 0x241   :  { %v1872_v61 = vpop.f32.mrb[68].mxu0 }
 0x242   :  { %v1496_v55 = vadd.f32 %v1872_v61, %v1806_v30  ;;  %v1487_v48 = vpop.f32.mrb[69].mxu0  ;;  %v1810_v57 = vpop.f32.mrb[48].mxu1 }
 0x243   :  { %v1488_v7 = vadd.f32 %v1800_v44, %v1487_v48  ;;  %v1873_v3 = vpop.f32.mrb[70].mxu0  ;;  %v1811_v19 = vpop.f32.mrb[49].mxu1 }
 0x244   :  { %1627 = vst [vmem:[%s2913_s3 + $0x30] sm:$0xff] %v1496_v55  ;;  %v1499_v28 = vadd.f32 %v1873_v3, %v1809_v26  ;;  %v1490_v2 = vpop.f32.mrb[71].mxu0  ;;  %v1812_v25 = vadd.f32 %v1811_v19, %v1810_v57  ;;  %v1813_v53 = vpop.f32.mrb[50].mxu1 }
 0x245   :  { %1625 = vst [vmem:[%s2913_s3 + $0x20] sm:$0xff] %v1488_v7  ;;  %v1491_v22 = vadd.f32 %v1803_v36, %v1490_v2  ;;  %v1814_v8 = vpop.f32.mrb[51].mxu1 }
 0x246   :  { %1628 = vst [vmem:[%s2913_s3 + $0x38] sm:$0xff] %v1499_v28  ;;  %v1815_v1 = vadd.f32 %v1814_v8, %v1813_v53 }
 0x247   :  { %1626 = vst [vmem:[%s2913_s3 + $0x28] sm:$0xff] %v1491_v22 }
 0x24a   :  { %v1816_v6 = vpop.f32.mrb[52].mxu1 }
 0x24b   :  { %v1817_v40 = vpop.f32.mrb[53].mxu1 }
 0x24c   :  { %v1818_v56 = vadd.f32 %v1817_v40, %v1816_v6  ;;  %v1819_v31 = vpop.f32.mrb[54].mxu1 }
 0x24d   :  { %v1820_v47 = vpop.f32.mrb[55].mxu1 }
 0x24e   :  { %v1821_v29 = vadd.f32 %v1820_v47, %v1819_v31 }
 0x252   :  { %v1822_v35 = vpop.f32.mrb[56].mxu1 }
 0x253   :  { %v1823_v16 = vpop.f32.mrb[57].mxu1 }
 0x254   :  { %v1824_v17 = vadd.f32 %v1823_v16, %v1822_v35  ;;  %v1825_v23 = vpop.f32.mrb[58].mxu1 }
 0x255   :  { %v1826_v4 = vpop.f32.mrb[59].mxu1 }
 0x256   :  { %v1827_v0 = vadd.f32 %v1826_v4, %v1825_v23 }
 0x25a   :  { %v1828_v38 = vpop.f32.mrb[60].mxu1 }
 0x25b   :  { %v1829_v27 = vpop.f32.mrb[61].mxu1 }
 0x25c   :  { %v1830_v13 = vadd.f32 %v1829_v27, %v1828_v38  ;;  %v1831_v9 = vpop.f32.mrb[62].mxu1 }
 0x25d   :  { %v1832_v34 = vpop.f32.mrb[63].mxu1 }
 0x25e   :  { %v1833_v15 = vadd.f32 %v1832_v34, %v1831_v9 }
 0x262   :  { %v1876_v63 = vpop.f32.mrb[64].mxu1 }
 0x263   :  { %v1512_v46 = vadd.f32 %v1876_v63, %v1818_v56  ;;  %v1503_v37 = vpop.f32.mrb[65].mxu1 }
 0x264   :  { %v1504_v43 = vadd.f32 %v1812_v25, %v1503_v37  ;;  %v1877_v52 = vpop.f32.mrb[66].mxu1 }
 0x265   :  { %1631 = vst [vmem:[%s2913_s3 + $0x50] sm:$0xff] %v1512_v46  ;;  %v1515_v59 = vadd.f32 %v1877_v52, %v1821_v29  ;;  %v1506_v21 = vpop.f32.mrb[67].mxu1 }
 0x266   :  { %1629 = vst [vmem:[%s2913_s3 + $0x40] sm:$0xff] %v1504_v43  ;;  %v1507_v45 = vadd.f32 %v1815_v1, %v1506_v21 }
 0x267   :  { %1632 = vst [vmem:[%s2913_s3 + $0x58] sm:$0xff] %v1515_v59 }
 0x268   :  { %1630 = vst [vmem:[%s2913_s3 + $0x48] sm:$0xff] %v1507_v45 }
 0x26a   :  { %v1880_v18 = vpop.f32.mrb[68].mxu1 }
 0x26b   :  { %v1528_v50 = vadd.f32 %v1880_v18, %v1830_v13  ;;  %v1519_v5 = vpop.f32.mrb[69].mxu1 }
 0x26c   :  { %v1520_v10 = vadd.f32 %v1824_v17, %v1519_v5  ;;  %v1881_v60 = vpop.f32.mrb[70].mxu1 }
 0x26d   :  { %1635 = vst [vmem:[%s2913_s3 + $0x70] sm:$0xff] %v1528_v50  ;;  %v1531_v11 = vadd.f32 %v1881_v60, %v1833_v15  ;;  %v1522_v32 = vpop.f32.mrb[71].mxu1 }
 0x26e   :  { %1633 = vst [vmem:[%s2913_s3 + $0x60] sm:$0xff] %v1520_v10  ;;  %v1523_v14 = vadd.f32 %v1827_v0, %v1522_v32 }
 0x26f   :  { %1636 = vst [vmem:[%s2913_s3 + $0x78] sm:$0xff] %v1531_v11 }
 0x270   :  { %1634 = vst [vmem:[%s2913_s3 + $0x68] sm:$0xff] %v1523_v14 }
 0x271   :  { %1641 = vsyncpa [#allocation4], 1 }

</bundles_post_ra>
